<compile_context>
chip_gen: v6e
topology: v6e:2x2x1
jax: 0.10.0
libtpu: 0.0.40
codegen_flags: <defaults>
</compile_context>

<pallas_src>
import functools

import jax
import jax.numpy as jnp
from jax.experimental import pallas as pl
from jax.experimental.pallas import tpu as pltpu


LANE = 128  # TPU lane width; all feature dims are zero-padded to this


# ----------------------------- helpers (glue) -----------------------------

def _round_up(x, m):
    return (x + m - 1) // m * m


def _pad_cols(x2d, cols, dtype=None):
    """Zero-pad last dim of a 2-D array to `cols`, optionally cast."""
    r, c = x2d.shape
    out = jnp.pad(x2d, ((0, 0), (0, cols - c)))
    return out.astype(dtype) if dtype is not None else out


def _pad2(w, rows, cols, dtype=None):
    r, c = w.shape
    out = jnp.pad(w, ((0, rows - r), (0, cols - c)))
    return out.astype(dtype) if dtype is not None else out


def patchify(images, patch):
    """NCHW images -> (B, N, C*P*P) patches."""
    B, C, H, W = images.shape
    x = images.reshape(B, C, H // patch, patch, W // patch, patch)
    x = x.transpose(0, 2, 4, 1, 3, 5)            # B, Hp, Wp, C, P, P
    return x.reshape(B, (H // patch) * (W // patch), C * patch * patch)


def gather_tokens(x, idx):
    """x: (B, N, D), idx: (B, K) int32 -> (B, K, D)  (== torch.gather on dim=1)."""
    B, K = idx.shape
    D = x.shape[-1]
    idx_b = jnp.broadcast_to(idx[:, :, None], (B, K, D))
    return jnp.take_along_axis(x, idx_b, axis=1)


# ----------------------------- fused Pallas kernel -----------------------------

def _mae_fused_kernel(
    # scalar-prefetch ref (SMEM)
    col_ref,
    # inputs (VMEM)
    patches_u_ref, pos_u_ref, pos_m_me_ref, loss_patch_ref,
    w_proj_ref, b_proj_ref,
    w_enc1_ref, b_enc1_ref, w_enc2_ref, b_enc2_ref,
    w_dec1_ref, b_dec1_ref, w_dec2_ref, b_dec2_ref,
    w_out_ref, b_out_ref,
    # outputs
    loss_ref, loss_out_ref,
    # scratch
    di_scratch, dp_scratch,
    *, n_unmasked_rows, n_total_rows, n_masked_rows, inv_n_valid):
    """Entire MAE forward on lane-padded, VMEM-resident blocks."""

    def mm(x, w_ref, b_ref):
        # bf16 MXU matmul, f32 accumulation, fused bias add (free VPU work).
        return (jnp.dot(x.astype(jnp.bfloat16), w_ref[...],
                        preferred_element_type=jnp.float32) + b_ref[...])

    pos_u = pos_u_ref[...]                                      # (B*Nu, D)

    # --- patch_encoder: patch embedding + positional embedding (unmasked rows) ---
    emb_u = mm(patches_u_ref[...], w_proj_ref, b_proj_ref) + pos_u

    # --- encoder (2-layer GELU MLP) + positional residual ---
    h = jax.nn.gelu(mm(emb_u, w_enc1_ref, b_enc1_ref), approximate=True)
    enc = mm(h, w_enc2_ref, b_enc2_ref) + pos_u

    # --- decoder input: [encoder rows ; masked rows] written at static offsets ---
    # (masked embeddings = mask-token projection + pos, hoisted to the wrapper)
    di_scratch[0:n_unmasked_rows, :] = enc
    di_scratch[n_unmasked_rows:n_total_rows, :] = pos_m_me_ref[...]

    # --- decoder (rowwise MLP) + patch_layer2 output projection ---
    hd = jax.nn.gelu(mm(di_scratch[...], w_dec1_ref, b_dec1_ref), approximate=True)
    do = mm(hd, w_dec2_ref, b_dec2_ref)
    dp_scratch[...] = mm(do, w_out_ref, b_out_ref)              # (B*N, PD)

    # --- gather decoder patches at mask positions: index-driven row gather ---
    # col_ref lives in SMEM (scalar prefetch); each read is one dynamic-slice row.
    for r in range(n_masked_rows):                              # small, fully unrolled
        row = col_ref[r]
        loss_out_ref[pl.ds(r, 1), :] = dp_scratch[pl.ds(row, 1), :]

    # --- masked-patch MSE (padded lanes are zero on both sides -> contribute 0) ---
    d = loss_patch_ref[...] - loss_out_ref[...]
    loss_ref[0, 0] = jnp.sum(d * d) * inv_n_valid


# ----------------------------- forward wrapper -----------------------------

@functools.partial(jax.jit, static_argnames=("patch",))
def mae_loss_forward(params, images, mask_indices, unmask_indices, *, patch):
    """Reproduces mae_loss.forward: scalar MSE over masked patches (+ gathered patches)."""
    patches = patchify(images, patch)                       # (B, N, pd) f32
    B, N, pd = patches.shape
    D = params["w_proj"].shape[1]
    Hd = params["w_enc1"].shape[1]
    Nm = mask_indices.shape[1]
    Nu = unmask_indices.shape[1]

    PD = _round_up(pd, LANE)
    DD = _round_up(D, LANE)
    HH = _round_up(Hd, LANE)

    # --- index-only / parameter-only glue (never touches activations) ---
    patches_u = gather_tokens(patches, unmask_indices).reshape(B * Nu, pd)
    loss_patch = gather_tokens(patches, mask_indices)       # (B, Nm, pd), stays f32
    pos_u = jnp.take(params["pos_emb"], unmask_indices, axis=0).reshape(B * Nu, D)
    pos_m = jnp.take(params["pos_emb"], mask_indices, axis=0).reshape(B * Nm, D)

    # Mask-token projection is parameter-only: hoist it out of the kernel (f32)
    # and fold it into the masked positional rows.
    mt_proj = params["mask_token"] @ params["w_proj"] + params["b_proj"]      # (D,)
    pos_m_me = pos_m + mt_proj[None, :]                                       # (B*Nm, D)

    # Decoder rows inside the kernel are stacked [unmasked-path (B*Nu) ; masked (B*Nm)].
    # Map each masked index v of batch b to its row in that stack (same concat
    # semantics as the reference: per-batch sequence = [encoder rows ; masked rows]).
    b_idx = jnp.arange(B, dtype=mask_indices.dtype)[:, None]
    col = jnp.where(mask_indices < Nu,
                    b_idx * Nu + mask_indices,
                    B * Nu + b_idx * Nm + (mask_indices - Nu))                # (B, Nm)
    col = col.reshape(B * Nm).astype(jnp.int32)

    bf, f32 = jnp.bfloat16, jnp.float32

    args = (
        _pad_cols(patches_u, PD, bf),
        _pad_cols(pos_u, DD, f32),
        _pad_cols(pos_m_me, DD, f32),
        _pad_cols(loss_patch.reshape(B * Nm, pd), PD, f32),
        _pad2(params["w_proj"], PD, DD, bf), _pad_cols(params["b_proj"][None, :], DD, f32),
        _pad2(params["w_enc1"], DD, HH, bf), _pad_cols(params["b_enc1"][None, :], HH, f32),
        _pad2(params["w_enc2"], HH, DD, bf), _pad_cols(params["b_enc2"][None, :], DD, f32),
        _pad2(params["w_dec1"], DD, HH, bf), _pad_cols(params["b_dec1"][None, :], HH, f32),
        _pad2(params["w_dec2"], HH, DD, bf), _pad_cols(params["b_dec2"][None, :], DD, f32),
        _pad2(params["w_out"], DD, PD, bf), _pad_cols(params["b_out"][None, :], PD, f32),
    )

    def vspec(a):
        nd = a.ndim
        # index_maps receive (grid_idx, scalar_prefetch_ref) positionally.
        return pl.BlockSpec(a.shape, lambda i, col_ref, _nd=nd: (0,) * _nd)

    kern = functools.partial(
        _mae_fused_kernel,
        n_unmasked_rows=B * Nu,
        n_total_rows=B * N,
        n_masked_rows=B * Nm,
        inv_n_valid=1.0 / float(B * Nm * pd))

    grid_spec = pltpu.PrefetchScalarGridSpec(
        num_scalar_prefetch=1,
        grid=(1,),
        in_specs=[vspec(a) for a in args],
        out_specs=(
            pl.BlockSpec(memory_space=pltpu.MemorySpace.SMEM),            # scalar loss
            pl.BlockSpec((B * Nm, PD), lambda i, col_ref: (0, 0)),        # gathered rows
        ),
        scratch_shapes=[
            pltpu.VMEM((B * N, DD), f32),   # decoder input  [enc ; masked]
            pltpu.VMEM((B * N, PD), f32),   # decoder patches (gather source)
        ],
    )

    loss2d, lo_pad = pl.pallas_call(
        kern,
        out_shape=(jax.ShapeDtypeStruct((1, 1), f32),
                   jax.ShapeDtypeStruct((B * Nm, PD), f32)),
        grid_spec=grid_spec,
        compiler_params=pltpu.CompilerParams(
            dimension_semantics=("arbitrary",),
            vmem_limit_bytes=32 * 1024 * 1024),
    )(col, *args)

    total_loss = loss2d[0, 0]
    loss_output = lo_pad[:, :pd].reshape(B, Nm, pd)
    return total_loss, loss_patch, loss_output


# ----------------------------- params + pure-JAX reference -----------------------------

def init_params(key, patch_dim, num_patches, embed_dim, hidden_dim):
    ks = jax.random.split(key, 8)
    s = 0.02
    return dict(
        w_proj=jax.random.normal(ks[0], (patch_dim, embed_dim), jnp.float32) * s,
        b_proj=jnp.zeros((embed_dim,), jnp.float32),
        pos_emb=jax.random.normal(ks[1], (num_patches, embed_dim), jnp.float32) * s,
        mask_token=jax.random.normal(ks[2], (patch_dim,), jnp.float32) * s,
        w_enc1=jax.random.normal(ks[3], (embed_dim, hidden_dim), jnp.float32) * s,
        b_enc1=jnp.zeros((hidden_dim,), jnp.float32),
        w_enc2=jax.random.normal(ks[4], (hidden_dim, embed_dim), jnp.float32) * s,
        b_enc2=jnp.zeros((embed_dim,), jnp.float32),
        w_dec1=jax.random.normal(ks[5], (embed_dim, hidden_dim), jnp.float32) * s,
        b_dec1=jnp.zeros((hidden_dim,), jnp.float32),
        w_dec2=jax.random.normal(ks[6], (hidden_dim, embed_dim), jnp.float32) * s,
        b_dec2=jnp.zeros((embed_dim,), jnp.float32),
        w_out=jax.random.normal(ks[7], (embed_dim, patch_dim), jnp.float32) * s,
        b_out=jnp.zeros((patch_dim,), jnp.float32),
    )


def _reference(params, images, mask_indices, unmask_indices, patch):
    patches = patchify(images, patch)
    B, N, pd = patches.shape
    D = params["w_proj"].shape[1]
    Nm = mask_indices.shape[1]

    lin = lambda x, w, b: x @ w + b
    patch_emb = lin(patches, params["w_proj"], params["b_proj"])
    pos = jnp.broadcast_to(params["pos_emb"][None], (B, N, D))

    up = gather_tokens(pos, unmask_indices)
    mp = gather_tokens(pos, mask_indices)
    ue = gather_tokens(patch_emb, unmask_indices) + up
    mt = jnp.broadcast_to(params["mask_token"][None, None, :], (B, Nm, pd))
    me = lin(mt, params["w_proj"], params["b_proj"]) + mp

    h = jax.nn.gelu(lin(ue, params["w_enc1"], params["b_enc1"]), approximate=True)
    eo = lin(h, params["w_enc2"], params["b_enc2"]) + up

    di = jnp.concatenate([eo, me], axis=1)
    h = jax.nn.gelu(lin(di, params["w_dec1"], params["b_dec1"]), approximate=True)
    do = lin(h, params["w_dec2"], params["b_dec2"])
    dp = lin(do, params["w_out"], params["b_out"])

    lp = gather_tokens(patches, mask_indices)
    lo = gather_tokens(dp, mask_indices)
    return jnp.mean((lp - lo) ** 2)


# ----------------------------------- main -----------------------------------

if __name__ == "__main__":
    B, C, H, W = 2, 4, 16, 16
    PATCH = 4
    N = (H // PATCH) * (W // PATCH)          # 16 patches
    PATCH_DIM = C * PATCH * PATCH            # 64
    EMBED_DIM = 32
    HIDDEN_DIM = 64
    MASK_RATIO = 0.5
    NM = int(N * MASK_RATIO)                 # 8 masked, 8 unmasked

    root = jax.random.PRNGKey(0)
    k_img, k_par, k_idx = jax.random.split(root, 3)

    images = jax.random.normal(k_img, (B, C, H, W), jnp.float32)
    params = init_params(k_par, PATCH_DIM, N, EMBED_DIM, HIDDEN_DIM)

    perm_keys = jax.random.split(k_idx, B)
    perms = jnp.stack([jax.random.permutation(k, N) for k in perm_keys]).astype(jnp.int32)
    mask_indices = perms[:, :NM]             # (B, NM)
    unmask_indices = perms[:, NM:]           # (B, N-NM)

    total_loss, loss_patch, loss_output = mae_loss_forward(
        params, images, mask_indices, unmask_indices, patch=PATCH)
    total_loss = jax.block_until_ready(total_loss)

    ref = _reference(params, images, mask_indices, unmask_indices, PATCH)
    assert jnp.allclose(total_loss, ref, rtol=1e-3, atol=1e-4), (total_loss, ref)

    print("KERNEL_OK")
</pallas_src>

<mosaic_0001>
module attributes {stable_mosaic.version = 11 : i64} {
  func.func @_mae_fused_kernel(%arg0: i32, %arg1: memref<16xi32, #tpu.memory_space<smem>>, %arg2: memref<16x128xbf16, #tpu.memory_space<vmem>>, %arg3: memref<16x128xf32, #tpu.memory_space<vmem>>, %arg4: memref<16x128xf32, #tpu.memory_space<vmem>>, %arg5: memref<16x128xf32, #tpu.memory_space<vmem>>, %arg6: memref<128x128xbf16, #tpu.memory_space<vmem>>, %arg7: memref<1x128xf32, #tpu.memory_space<vmem>>, %arg8: memref<128x128xbf16, #tpu.memory_space<vmem>>, %arg9: memref<1x128xf32, #tpu.memory_space<vmem>>, %arg10: memref<128x128xbf16, #tpu.memory_space<vmem>>, %arg11: memref<1x128xf32, #tpu.memory_space<vmem>>, %arg12: memref<128x128xbf16, #tpu.memory_space<vmem>>, %arg13: memref<1x128xf32, #tpu.memory_space<vmem>>, %arg14: memref<128x128xbf16, #tpu.memory_space<vmem>>, %arg15: memref<1x128xf32, #tpu.memory_space<vmem>>, %arg16: memref<128x128xbf16, #tpu.memory_space<vmem>>, %arg17: memref<1x128xf32, #tpu.memory_space<vmem>>, %arg18: memref<1x1xf32, #tpu.memory_space<smem>>, %arg19: memref<16x128xf32, #tpu.memory_space<vmem>>, %arg20: memref<32x128xf32, #tpu.memory_space<vmem>>, %arg21: memref<32x128xf32, #tpu.memory_space<vmem>>) attributes {dimension_semantics = [#tpu.dimension_semantics<arbitrary>], iteration_bounds = array<i64: 1>, scalar_prefetch = 1 : i64, scratch_operands = 2 : i64, tpu.core_type = #tpu.core_type<tc>, window_params = [{pipeline_mode = #tpu.pipeline_mode<synchronous>, transform_indices = @transform_0, window_bounds = array<i64: 16, 128>}, {pipeline_mode = #tpu.pipeline_mode<synchronous>, transform_indices = @transform_1, window_bounds = array<i64: 16, 128>}, {pipeline_mode = #tpu.pipeline_mode<synchronous>, transform_indices = @transform_2, window_bounds = array<i64: 16, 128>}, {pipeline_mode = #tpu.pipeline_mode<synchronous>, transform_indices = @transform_3, window_bounds = array<i64: 16, 128>}, {pipeline_mode = #tpu.pipeline_mode<synchronous>, transform_indices = @transform_4, window_bounds = array<i64: 128, 128>}, {pipeline_mode = #tpu.pipeline_mode<synchronous>, transform_indices = @transform_5, window_bounds = array<i64: 1, 128>}, {pipeline_mode = #tpu.pipeline_mode<synchronous>, transform_indices = @transform_6, window_bounds = array<i64: 128, 128>}, {pipeline_mode = #tpu.pipeline_mode<synchronous>, transform_indices = @transform_7, window_bounds = array<i64: 1, 128>}, {pipeline_mode = #tpu.pipeline_mode<synchronous>, transform_indices = @transform_8, window_bounds = array<i64: 128, 128>}, {pipeline_mode = #tpu.pipeline_mode<synchronous>, transform_indices = @transform_9, window_bounds = array<i64: 1, 128>}, {pipeline_mode = #tpu.pipeline_mode<synchronous>, transform_indices = @transform_10, window_bounds = array<i64: 128, 128>}, {pipeline_mode = #tpu.pipeline_mode<synchronous>, transform_indices = @transform_11, window_bounds = array<i64: 1, 128>}, {pipeline_mode = #tpu.pipeline_mode<synchronous>, transform_indices = @transform_12, window_bounds = array<i64: 128, 128>}, {pipeline_mode = #tpu.pipeline_mode<synchronous>, transform_indices = @transform_13, window_bounds = array<i64: 1, 128>}, {pipeline_mode = #tpu.pipeline_mode<synchronous>, transform_indices = @transform_14, window_bounds = array<i64: 128, 128>}, {pipeline_mode = #tpu.pipeline_mode<synchronous>, transform_indices = @transform_15, window_bounds = array<i64: 1, 128>}, {transform_indices = @transform_16, window_bounds = array<i64: 1, 1>}, {pipeline_mode = #tpu.pipeline_mode<synchronous>, transform_indices = @transform_17, window_bounds = array<i64: 16, 128>}]} {
    %c0 = arith.constant 0 : index
    %c0_0 = arith.constant 0 : index
    %0 = vector.load %arg3[%c0, %c0_0] : memref<16x128xf32, #tpu.memory_space<vmem>>, vector<16x128xf32>
    %c0_1 = arith.constant 0 : index
    %c0_2 = arith.constant 0 : index
    %1 = vector.load %arg2[%c0_1, %c0_2] : memref<16x128xbf16, #tpu.memory_space<vmem>>, vector<16x128xbf16>
    %c0_3 = arith.constant 0 : index
    %c0_4 = arith.constant 0 : index
    %2 = vector.load %arg6[%c0_3, %c0_4] : memref<128x128xbf16, #tpu.memory_space<vmem>>, vector<128x128xbf16>
    %cst = arith.constant dense<0.000000e+00> : vector<16x128xf32>
    %3 = tpu.matmul %1, %2, %cst {dimension_numbers = #tpu.dot_dimension_numbers<[1], [0], [0], [1], [0, 0, 1, 1], [], []>} : vector<16x128xbf16>, vector<128x128xbf16>, vector<16x128xf32> -> vector<16x128xf32>
    %c0_5 = arith.constant 0 : index
    %c0_6 = arith.constant 0 : index
    %4 = vector.load %arg7[%c0_5, %c0_6] : memref<1x128xf32, #tpu.memory_space<vmem>>, vector<1x128xf32>
    %5 = vector.broadcast %4 : vector<1x128xf32> to vector<16x128xf32>
    %6 = arith.addf %3, %5 : vector<16x128xf32>
    %7 = arith.addf %6, %0 : vector<16x128xf32>
    %8 = arith.truncf %7 : vector<16x128xf32> to vector<16x128xbf16>
    %c0_7 = arith.constant 0 : index
    %c0_8 = arith.constant 0 : index
    %9 = vector.load %arg8[%c0_7, %c0_8] : memref<128x128xbf16, #tpu.memory_space<vmem>>, vector<128x128xbf16>
    %cst_9 = arith.constant dense<0.000000e+00> : vector<16x128xf32>
    %10 = tpu.matmul %8, %9, %cst_9 {dimension_numbers = #tpu.dot_dimension_numbers<[1], [0], [0], [1], [0, 0, 1, 1], [], []>} : vector<16x128xbf16>, vector<128x128xbf16>, vector<16x128xf32> -> vector<16x128xf32>
    %c0_10 = arith.constant 0 : index
    %c0_11 = arith.constant 0 : index
    %11 = vector.load %arg9[%c0_10, %c0_11] : memref<1x128xf32, #tpu.memory_space<vmem>>, vector<1x128xf32>
    %12 = vector.broadcast %11 : vector<1x128xf32> to vector<16x128xf32>
    %13 = arith.addf %10, %12 : vector<16x128xf32>
    %14 = arith.mulf %13, %13 : vector<16x128xf32>
    %15 = arith.mulf %13, %14 : vector<16x128xf32>
    %cst_12 = arith.constant 4.471500e-02 : f32
    %16 = vector.broadcast %cst_12 : f32 to vector<16x128xf32>
    %17 = arith.mulf %16, %15 : vector<16x128xf32>
    %18 = arith.addf %13, %17 : vector<16x128xf32>
    %cst_13 = arith.constant 0.797884583 : f32
    %19 = vector.broadcast %cst_13 : f32 to vector<16x128xf32>
    %20 = arith.mulf %19, %18 : vector<16x128xf32>
    %21 = math.tanh %20 : vector<16x128xf32>
    %cst_14 = arith.constant 1.000000e+00 : f32
    %22 = vector.broadcast %cst_14 : f32 to vector<16x128xf32>
    %23 = arith.addf %22, %21 : vector<16x128xf32>
    %cst_15 = arith.constant 5.000000e-01 : f32
    %24 = vector.broadcast %cst_15 : f32 to vector<16x128xf32>
    %25 = arith.mulf %24, %23 : vector<16x128xf32>
    %26 = arith.mulf %13, %25 : vector<16x128xf32>
    %27 = arith.truncf %26 : vector<16x128xf32> to vector<16x128xbf16>
    %c0_16 = arith.constant 0 : index
    %c0_17 = arith.constant 0 : index
    %28 = vector.load %arg10[%c0_16, %c0_17] : memref<128x128xbf16, #tpu.memory_space<vmem>>, vector<128x128xbf16>
    %cst_18 = arith.constant dense<0.000000e+00> : vector<16x128xf32>
    %29 = tpu.matmul %27, %28, %cst_18 {dimension_numbers = #tpu.dot_dimension_numbers<[1], [0], [0], [1], [0, 0, 1, 1], [], []>} : vector<16x128xbf16>, vector<128x128xbf16>, vector<16x128xf32> -> vector<16x128xf32>
    %c0_19 = arith.constant 0 : index
    %c0_20 = arith.constant 0 : index
    %30 = vector.load %arg11[%c0_19, %c0_20] : memref<1x128xf32, #tpu.memory_space<vmem>>, vector<1x128xf32>
    %31 = vector.broadcast %30 : vector<1x128xf32> to vector<16x128xf32>
    %32 = arith.addf %29, %31 : vector<16x128xf32>
    %33 = arith.addf %32, %0 : vector<16x128xf32>
    %c0_21 = arith.constant 0 : index
    %c0_22 = arith.constant 0 : index
    %34 = vector.load %arg20[%c0_21, %c0_22] : memref<32x128xf32, #tpu.memory_space<vmem>>, vector<16x128xf32>
    tpu.vector_store %arg20[%c0_21, %c0_22], %33 {strides = array<i32>} : memref<32x128xf32, #tpu.memory_space<vmem>>, vector<16x128xf32>,
    %c0_23 = arith.constant 0 : index
    %c0_24 = arith.constant 0 : index
    %35 = vector.load %arg4[%c0_23, %c0_24] : memref<16x128xf32, #tpu.memory_space<vmem>>, vector<16x128xf32>
    %c16 = arith.constant 16 : index
    %c0_25 = arith.constant 0 : index
    %36 = vector.load %arg20[%c16, %c0_25] : memref<32x128xf32, #tpu.memory_space<vmem>>, vector<16x128xf32>
    tpu.vector_store %arg20[%c16, %c0_25], %35 {strides = array<i32>} : memref<32x128xf32, #tpu.memory_space<vmem>>, vector<16x128xf32>,
    %c0_26 = arith.constant 0 : index
    %c0_27 = arith.constant 0 : index
    %37 = vector.load %arg20[%c0_26, %c0_27] : memref<32x128xf32, #tpu.memory_space<vmem>>, vector<32x128xf32>
    %38 = arith.truncf %37 : vector<32x128xf32> to vector<32x128xbf16>
    %c0_28 = arith.constant 0 : index
    %c0_29 = arith.constant 0 : index
    %39 = vector.load %arg12[%c0_28, %c0_29] : memref<128x128xbf16, #tpu.memory_space<vmem>>, vector<128x128xbf16>
    %cst_30 = arith.constant dense<0.000000e+00> : vector<32x128xf32>
    %40 = tpu.matmul %38, %39, %cst_30 {dimension_numbers = #tpu.dot_dimension_numbers<[1], [0], [0], [1], [0, 0, 1, 1], [], []>} : vector<32x128xbf16>, vector<128x128xbf16>, vector<32x128xf32> -> vector<32x128xf32>
    %c0_31 = arith.constant 0 : index
    %c0_32 = arith.constant 0 : index
    %41 = vector.load %arg13[%c0_31, %c0_32] : memref<1x128xf32, #tpu.memory_space<vmem>>, vector<1x128xf32>
    %42 = vector.broadcast %41 : vector<1x128xf32> to vector<32x128xf32>
    %43 = arith.addf %40, %42 : vector<32x128xf32>
    %44 = arith.mulf %43, %43 : vector<32x128xf32>
    %45 = arith.mulf %43, %44 : vector<32x128xf32>
    %cst_33 = arith.constant 4.471500e-02 : f32
    %46 = vector.broadcast %cst_33 : f32 to vector<32x128xf32>
    %47 = arith.mulf %46, %45 : vector<32x128xf32>
    %48 = arith.addf %43, %47 : vector<32x128xf32>
    %cst_34 = arith.constant 0.797884583 : f32
    %49 = vector.broadcast %cst_34 : f32 to vector<32x128xf32>
    %50 = arith.mulf %49, %48 : vector<32x128xf32>
    %51 = math.tanh %50 : vector<32x128xf32>
    %cst_35 = arith.constant 1.000000e+00 : f32
    %52 = vector.broadcast %cst_35 : f32 to vector<32x128xf32>
    %53 = arith.addf %52, %51 : vector<32x128xf32>
    %cst_36 = arith.constant 5.000000e-01 : f32
    %54 = vector.broadcast %cst_36 : f32 to vector<32x128xf32>
    %55 = arith.mulf %54, %53 : vector<32x128xf32>
    %56 = arith.mulf %43, %55 : vector<32x128xf32>
    %57 = arith.truncf %56 : vector<32x128xf32> to vector<32x128xbf16>
    %c0_37 = arith.constant 0 : index
    %c0_38 = arith.constant 0 : index
    %58 = vector.load %arg14[%c0_37, %c0_38] : memref<128x128xbf16, #tpu.memory_space<vmem>>, vector<128x128xbf16>
    %cst_39 = arith.constant dense<0.000000e+00> : vector<32x128xf32>
    %59 = tpu.matmul %57, %58, %cst_39 {dimension_numbers = #tpu.dot_dimension_numbers<[1], [0], [0], [1], [0, 0, 1, 1], [], []>} : vector<32x128xbf16>, vector<128x128xbf16>, vector<32x128xf32> -> vector<32x128xf32>
    %c0_40 = arith.constant 0 : index
    %c0_41 = arith.constant 0 : index
    %60 = vector.load %arg15[%c0_40, %c0_41] : memref<1x128xf32, #tpu.memory_space<vmem>>, vector<1x128xf32>
    %61 = vector.broadcast %60 : vector<1x128xf32> to vector<32x128xf32>
    %62 = arith.addf %59, %61 : vector<32x128xf32>
    %63 = arith.truncf %62 : vector<32x128xf32> to vector<32x128xbf16>
    %c0_42 = arith.constant 0 : index
    %c0_43 = arith.constant 0 : index
    %64 = vector.load %arg16[%c0_42, %c0_43] : memref<128x128xbf16, #tpu.memory_space<vmem>>, vector<128x128xbf16>
    %cst_44 = arith.constant dense<0.000000e+00> : vector<32x128xf32>
    %65 = tpu.matmul %63, %64, %cst_44 {dimension_numbers = #tpu.dot_dimension_numbers<[1], [0], [0], [1], [0, 0, 1, 1], [], []>} : vector<32x128xbf16>, vector<128x128xbf16>, vector<32x128xf32> -> vector<32x128xf32>
    %c0_45 = arith.constant 0 : index
    %c0_46 = arith.constant 0 : index
    %66 = vector.load %arg17[%c0_45, %c0_46] : memref<1x128xf32, #tpu.memory_space<vmem>>, vector<1x128xf32>
    %67 = vector.broadcast %66 : vector<1x128xf32> to vector<32x128xf32>
    %68 = arith.addf %65, %67 : vector<32x128xf32>
    %c0_47 = arith.constant 0 : index
    %c0_48 = arith.constant 0 : index
    %69 = vector.load %arg21[%c0_47, %c0_48] : memref<32x128xf32, #tpu.memory_space<vmem>>, vector<32x128xf32>
    tpu.vector_store %arg21[%c0_47, %c0_48], %68 {strides = array<i32>} : memref<32x128xf32, #tpu.memory_space<vmem>>, vector<32x128xf32>,
    %c0_49 = arith.constant 0 : index
    %70 = memref.load %arg1[%c0_49] : memref<16xi32, #tpu.memory_space<smem>>
    %71 = arith.index_cast %70 : i32 to index
    %c0_50 = arith.constant 0 : index
    %72 = vector.load %arg21[%71, %c0_50] : memref<32x128xf32, #tpu.memory_space<vmem>>, vector<1x128xf32>
    %c0_51 = arith.constant 0 : index
    %c0_52 = arith.constant 0 : index
    %73 = vector.load %arg19[%c0_51, %c0_52] : memref<16x128xf32, #tpu.memory_space<vmem>>, vector<1x128xf32>
    tpu.vector_store %arg19[%c0_51, %c0_52], %72 {strides = array<i32>} : memref<16x128xf32, #tpu.memory_space<vmem>>, vector<1x128xf32>,
    %c1 = arith.constant 1 : index
    %74 = memref.load %arg1[%c1] : memref<16xi32, #tpu.memory_space<smem>>
    %75 = arith.index_cast %74 : i32 to index
    %c0_53 = arith.constant 0 : index
    %76 = vector.load %arg21[%75, %c0_53] : memref<32x128xf32, #tpu.memory_space<vmem>>, vector<1x128xf32>
    %c1_54 = arith.constant 1 : index
    %c0_55 = arith.constant 0 : index
    %77 = vector.load %arg19[%c1_54, %c0_55] : memref<16x128xf32, #tpu.memory_space<vmem>>, vector<1x128xf32>
    tpu.vector_store %arg19[%c1_54, %c0_55], %76 {strides = array<i32>} : memref<16x128xf32, #tpu.memory_space<vmem>>, vector<1x128xf32>,
    %c2 = arith.constant 2 : index
    %78 = memref.load %arg1[%c2] : memref<16xi32, #tpu.memory_space<smem>>
    %79 = arith.index_cast %78 : i32 to index
    %c0_56 = arith.constant 0 : index
    %80 = vector.load %arg21[%79, %c0_56] : memref<32x128xf32, #tpu.memory_space<vmem>>, vector<1x128xf32>
    %c2_57 = arith.constant 2 : index
    %c0_58 = arith.constant 0 : index
    %81 = vector.load %arg19[%c2_57, %c0_58] : memref<16x128xf32, #tpu.memory_space<vmem>>, vector<1x128xf32>
    tpu.vector_store %arg19[%c2_57, %c0_58], %80 {strides = array<i32>} : memref<16x128xf32, #tpu.memory_space<vmem>>, vector<1x128xf32>,
    %c3 = arith.constant 3 : index
    %82 = memref.load %arg1[%c3] : memref<16xi32, #tpu.memory_space<smem>>
    %83 = arith.index_cast %82 : i32 to index
    %c0_59 = arith.constant 0 : index
    %84 = vector.load %arg21[%83, %c0_59] : memref<32x128xf32, #tpu.memory_space<vmem>>, vector<1x128xf32>
    %c3_60 = arith.constant 3 : index
    %c0_61 = arith.constant 0 : index
    %85 = vector.load %arg19[%c3_60, %c0_61] : memref<16x128xf32, #tpu.memory_space<vmem>>, vector<1x128xf32>
    tpu.vector_store %arg19[%c3_60, %c0_61], %84 {strides = array<i32>} : memref<16x128xf32, #tpu.memory_space<vmem>>, vector<1x128xf32>,
    %c4 = arith.constant 4 : index
    %86 = memref.load %arg1[%c4] : memref<16xi32, #tpu.memory_space<smem>>
    %87 = arith.index_cast %86 : i32 to index
    %c0_62 = arith.constant 0 : index
    %88 = vector.load %arg21[%87, %c0_62] : memref<32x128xf32, #tpu.memory_space<vmem>>, vector<1x128xf32>
    %c4_63 = arith.constant 4 : index
    %c0_64 = arith.constant 0 : index
    %89 = vector.load %arg19[%c4_63, %c0_64] : memref<16x128xf32, #tpu.memory_space<vmem>>, vector<1x128xf32>
    tpu.vector_store %arg19[%c4_63, %c0_64], %88 {strides = array<i32>} : memref<16x128xf32, #tpu.memory_space<vmem>>, vector<1x128xf32>,
    %c5 = arith.constant 5 : index
    %90 = memref.load %arg1[%c5] : memref<16xi32, #tpu.memory_space<smem>>
    %91 = arith.index_cast %90 : i32 to index
    %c0_65 = arith.constant 0 : index
    %92 = vector.load %arg21[%91, %c0_65] : memref<32x128xf32, #tpu.memory_space<vmem>>, vector<1x128xf32>
    %c5_66 = arith.constant 5 : index
    %c0_67 = arith.constant 0 : index
    %93 = vector.load %arg19[%c5_66, %c0_67] : memref<16x128xf32, #tpu.memory_space<vmem>>, vector<1x128xf32>
    tpu.vector_store %arg19[%c5_66, %c0_67], %92 {strides = array<i32>} : memref<16x128xf32, #tpu.memory_space<vmem>>, vector<1x128xf32>,
    %c6 = arith.constant 6 : index
    %94 = memref.load %arg1[%c6] : memref<16xi32, #tpu.memory_space<smem>>
    %95 = arith.index_cast %94 : i32 to index
    %c0_68 = arith.constant 0 : index
    %96 = vector.load %arg21[%95, %c0_68] : memref<32x128xf32, #tpu.memory_space<vmem>>, vector<1x128xf32>
    %c6_69 = arith.constant 6 : index
    %c0_70 = arith.constant 0 : index
    %97 = vector.load %arg19[%c6_69, %c0_70] : memref<16x128xf32, #tpu.memory_space<vmem>>, vector<1x128xf32>
    tpu.vector_store %arg19[%c6_69, %c0_70], %96 {strides = array<i32>} : memref<16x128xf32, #tpu.memory_space<vmem>>, vector<1x128xf32>,
    %c7 = arith.constant 7 : index
    %98 = memref.load %arg1[%c7] : memref<16xi32, #tpu.memory_space<smem>>
    %99 = arith.index_cast %98 : i32 to index
    %c0_71 = arith.constant 0 : index
    %100 = vector.load %arg21[%99, %c0_71] : memref<32x128xf32, #tpu.memory_space<vmem>>, vector<1x128xf32>
    %c7_72 = arith.constant 7 : index
    %c0_73 = arith.constant 0 : index
    %101 = vector.load %arg19[%c7_72, %c0_73] : memref<16x128xf32, #tpu.memory_space<vmem>>, vector<1x128xf32>
    tpu.vector_store %arg19[%c7_72, %c0_73], %100 {strides = array<i32>} : memref<16x128xf32, #tpu.memory_space<vmem>>, vector<1x128xf32>,
    %c8 = arith.constant 8 : index
    %102 = memref.load %arg1[%c8] : memref<16xi32, #tpu.memory_space<smem>>
    %103 = arith.index_cast %102 : i32 to index
    %c0_74 = arith.constant 0 : index
    %104 = vector.load %arg21[%103, %c0_74] : memref<32x128xf32, #tpu.memory_space<vmem>>, vector<1x128xf32>
    %c8_75 = arith.constant 8 : index
    %c0_76 = arith.constant 0 : index
    %105 = vector.load %arg19[%c8_75, %c0_76] : memref<16x128xf32, #tpu.memory_space<vmem>>, vector<1x128xf32>
    tpu.vector_store %arg19[%c8_75, %c0_76], %104 {strides = array<i32>} : memref<16x128xf32, #tpu.memory_space<vmem>>, vector<1x128xf32>,
    %c9 = arith.constant 9 : index
    %106 = memref.load %arg1[%c9] : memref<16xi32, #tpu.memory_space<smem>>
    %107 = arith.index_cast %106 : i32 to index
    %c0_77 = arith.constant 0 : index
    %108 = vector.load %arg21[%107, %c0_77] : memref<32x128xf32, #tpu.memory_space<vmem>>, vector<1x128xf32>
    %c9_78 = arith.constant 9 : index
    %c0_79 = arith.constant 0 : index
    %109 = vector.load %arg19[%c9_78, %c0_79] : memref<16x128xf32, #tpu.memory_space<vmem>>, vector<1x128xf32>
    tpu.vector_store %arg19[%c9_78, %c0_79], %108 {strides = array<i32>} : memref<16x128xf32, #tpu.memory_space<vmem>>, vector<1x128xf32>,
    %c10 = arith.constant 10 : index
    %110 = memref.load %arg1[%c10] : memref<16xi32, #tpu.memory_space<smem>>
    %111 = arith.index_cast %110 : i32 to index
    %c0_80 = arith.constant 0 : index
    %112 = vector.load %arg21[%111, %c0_80] : memref<32x128xf32, #tpu.memory_space<vmem>>, vector<1x128xf32>
    %c10_81 = arith.constant 10 : index
    %c0_82 = arith.constant 0 : index
    %113 = vector.load %arg19[%c10_81, %c0_82] : memref<16x128xf32, #tpu.memory_space<vmem>>, vector<1x128xf32>
    tpu.vector_store %arg19[%c10_81, %c0_82], %112 {strides = array<i32>} : memref<16x128xf32, #tpu.memory_space<vmem>>, vector<1x128xf32>,
    %c11 = arith.constant 11 : index
    %114 = memref.load %arg1[%c11] : memref<16xi32, #tpu.memory_space<smem>>
    %115 = arith.index_cast %114 : i32 to index
    %c0_83 = arith.constant 0 : index
    %116 = vector.load %arg21[%115, %c0_83] : memref<32x128xf32, #tpu.memory_space<vmem>>, vector<1x128xf32>
    %c11_84 = arith.constant 11 : index
    %c0_85 = arith.constant 0 : index
    %117 = vector.load %arg19[%c11_84, %c0_85] : memref<16x128xf32, #tpu.memory_space<vmem>>, vector<1x128xf32>
    tpu.vector_store %arg19[%c11_84, %c0_85], %116 {strides = array<i32>} : memref<16x128xf32, #tpu.memory_space<vmem>>, vector<1x128xf32>,
    %c12 = arith.constant 12 : index
    %118 = memref.load %arg1[%c12] : memref<16xi32, #tpu.memory_space<smem>>
    %119 = arith.index_cast %118 : i32 to index
    %c0_86 = arith.constant 0 : index
    %120 = vector.load %arg21[%119, %c0_86] : memref<32x128xf32, #tpu.memory_space<vmem>>, vector<1x128xf32>
    %c12_87 = arith.constant 12 : index
    %c0_88 = arith.constant 0 : index
    %121 = vector.load %arg19[%c12_87, %c0_88] : memref<16x128xf32, #tpu.memory_space<vmem>>, vector<1x128xf32>
    tpu.vector_store %arg19[%c12_87, %c0_88], %120 {strides = array<i32>} : memref<16x128xf32, #tpu.memory_space<vmem>>, vector<1x128xf32>,
    %c13 = arith.constant 13 : index
    %122 = memref.load %arg1[%c13] : memref<16xi32, #tpu.memory_space<smem>>
    %123 = arith.index_cast %122 : i32 to index
    %c0_89 = arith.constant 0 : index
    %124 = vector.load %arg21[%123, %c0_89] : memref<32x128xf32, #tpu.memory_space<vmem>>, vector<1x128xf32>
    %c13_90 = arith.constant 13 : index
    %c0_91 = arith.constant 0 : index
    %125 = vector.load %arg19[%c13_90, %c0_91] : memref<16x128xf32, #tpu.memory_space<vmem>>, vector<1x128xf32>
    tpu.vector_store %arg19[%c13_90, %c0_91], %124 {strides = array<i32>} : memref<16x128xf32, #tpu.memory_space<vmem>>, vector<1x128xf32>,
    %c14 = arith.constant 14 : index
    %126 = memref.load %arg1[%c14] : memref<16xi32, #tpu.memory_space<smem>>
    %127 = arith.index_cast %126 : i32 to index
    %c0_92 = arith.constant 0 : index
    %128 = vector.load %arg21[%127, %c0_92] : memref<32x128xf32, #tpu.memory_space<vmem>>, vector<1x128xf32>
    %c14_93 = arith.constant 14 : index
    %c0_94 = arith.constant 0 : index
    %129 = vector.load %arg19[%c14_93, %c0_94] : memref<16x128xf32, #tpu.memory_space<vmem>>, vector<1x128xf32>
    tpu.vector_store %arg19[%c14_93, %c0_94], %128 {strides = array<i32>} : memref<16x128xf32, #tpu.memory_space<vmem>>, vector<1x128xf32>,
    %c15 = arith.constant 15 : index
    %130 = memref.load %arg1[%c15] : memref<16xi32, #tpu.memory_space<smem>>
    %131 = arith.index_cast %130 : i32 to index
    %c0_95 = arith.constant 0 : index
    %132 = vector.load %arg21[%131, %c0_95] : memref<32x128xf32, #tpu.memory_space<vmem>>, vector<1x128xf32>
    %c15_96 = arith.constant 15 : index
    %c0_97 = arith.constant 0 : index
    %133 = vector.load %arg19[%c15_96, %c0_97] : memref<16x128xf32, #tpu.memory_space<vmem>>, vector<1x128xf32>
    tpu.vector_store %arg19[%c15_96, %c0_97], %132 {strides = array<i32>} : memref<16x128xf32, #tpu.memory_space<vmem>>, vector<1x128xf32>,
    %c0_98 = arith.constant 0 : index
    %c0_99 = arith.constant 0 : index
    %134 = vector.load %arg5[%c0_98, %c0_99] : memref<16x128xf32, #tpu.memory_space<vmem>>, vector<16x128xf32>
    %c0_100 = arith.constant 0 : index
    %c0_101 = arith.constant 0 : index
    %135 = vector.load %arg19[%c0_100, %c0_101] : memref<16x128xf32, #tpu.memory_space<vmem>>, vector<16x128xf32>
    %136 = arith.subf %134, %135 : vector<16x128xf32>
    %137 = arith.mulf %136, %136 : vector<16x128xf32>
    %138 = vector.shape_cast %137 : vector<16x128xf32> to vector<1x16x128xf32>
    %cst_102 = arith.constant dense<0.000000e+00> : vector<1xf32>
    %139 = vector.multi_reduction <add>, %138, %cst_102 [1, 2] : vector<1x16x128xf32> to vector<1xf32>
    %140 = vector.shape_cast %139 : vector<1xf32> to vector<1x1x1xf32>
    %141 = vector.extract %140[0, 0, 0] : f32 from vector<1x1x1xf32>
    %cst_103 = arith.constant 9.765625E-4 : f32
    %142 = arith.mulf %141, %cst_103 : f32
    %c0_104 = arith.constant 0 : index
    %c0_105 = arith.constant 0 : index
    %143 = memref.load %arg18[%c0_104, %c0_105] : memref<1x1xf32, #tpu.memory_space<smem>>
    memref.store %142, %arg18[%c0_104, %c0_105] : memref<1x1xf32, #tpu.memory_space<smem>>
    return
  }
  func.func @transform_0(%arg0: i32, %arg1: memref<16xi32, #tpu.memory_space<smem>>) -> (i32, i32) {
    %c0_i32 = arith.constant 0 : i32
    %c0_i32_0 = arith.constant 0 : i32
    %c0_i32_1 = arith.constant 0 : i32
    return %c0_i32, %c0_i32_0 : i32, i32
  }
  func.func @transform_1(%arg0: i32, %arg1: memref<16xi32, #tpu.memory_space<smem>>) -> (i32, i32) {
    %c0_i32 = arith.constant 0 : i32
    %c0_i32_0 = arith.constant 0 : i32
    %c0_i32_1 = arith.constant 0 : i32
    return %c0_i32, %c0_i32_0 : i32, i32
  }
  func.func @transform_2(%arg0: i32, %arg1: memref<16xi32, #tpu.memory_space<smem>>) -> (i32, i32) {
    %c0_i32 = arith.constant 0 : i32
    %c0_i32_0 = arith.constant 0 : i32
    %c0_i32_1 = arith.constant 0 : i32
    return %c0_i32, %c0_i32_0 : i32, i32
  }
  func.func @transform_3(%arg0: i32, %arg1: memref<16xi32, #tpu.memory_space<smem>>) -> (i32, i32) {
    %c0_i32 = arith.constant 0 : i32
    %c0_i32_0 = arith.constant 0 : i32
    %c0_i32_1 = arith.constant 0 : i32
    return %c0_i32, %c0_i32_0 : i32, i32
  }
  func.func @transform_4(%arg0: i32, %arg1: memref<16xi32, #tpu.memory_space<smem>>) -> (i32, i32) {
    %c0_i32 = arith.constant 0 : i32
    %c0_i32_0 = arith.constant 0 : i32
    %c0_i32_1 = arith.constant 0 : i32
    return %c0_i32, %c0_i32_0 : i32, i32
  }
  func.func @transform_5(%arg0: i32, %arg1: memref<16xi32, #tpu.memory_space<smem>>) -> (i32, i32) {
    %c0_i32 = arith.constant 0 : i32
    %c0_i32_0 = arith.constant 0 : i32
    %c0_i32_1 = arith.constant 0 : i32
    return %c0_i32, %c0_i32_0 : i32, i32
  }
  func.func @transform_6(%arg0: i32, %arg1: memref<16xi32, #tpu.memory_space<smem>>) -> (i32, i32) {
    %c0_i32 = arith.constant 0 : i32
    %c0_i32_0 = arith.constant 0 : i32
    %c0_i32_1 = arith.constant 0 : i32
    return %c0_i32, %c0_i32_0 : i32, i32
  }
  func.func @transform_7(%arg0: i32, %arg1: memref<16xi32, #tpu.memory_space<smem>>) -> (i32, i32) {
    %c0_i32 = arith.constant 0 : i32
    %c0_i32_0 = arith.constant 0 : i32
    %c0_i32_1 = arith.constant 0 : i32
    return %c0_i32, %c0_i32_0 : i32, i32
  }
  func.func @transform_8(%arg0: i32, %arg1: memref<16xi32, #tpu.memory_space<smem>>) -> (i32, i32) {
    %c0_i32 = arith.constant 0 : i32
    %c0_i32_0 = arith.constant 0 : i32
    %c0_i32_1 = arith.constant 0 : i32
    return %c0_i32, %c0_i32_0 : i32, i32
  }
  func.func @transform_9(%arg0: i32, %arg1: memref<16xi32, #tpu.memory_space<smem>>) -> (i32, i32) {
    %c0_i32 = arith.constant 0 : i32
    %c0_i32_0 = arith.constant 0 : i32
    %c0_i32_1 = arith.constant 0 : i32
    return %c0_i32, %c0_i32_0 : i32, i32
  }
  func.func @transform_10(%arg0: i32, %arg1: memref<16xi32, #tpu.memory_space<smem>>) -> (i32, i32) {
    %c0_i32 = arith.constant 0 : i32
    %c0_i32_0 = arith.constant 0 : i32
    %c0_i32_1 = arith.constant 0 : i32
    return %c0_i32, %c0_i32_0 : i32, i32
  }
  func.func @transform_11(%arg0: i32, %arg1: memref<16xi32, #tpu.memory_space<smem>>) -> (i32, i32) {
    %c0_i32 = arith.constant 0 : i32
    %c0_i32_0 = arith.constant 0 : i32
    %c0_i32_1 = arith.constant 0 : i32
    return %c0_i32, %c0_i32_0 : i32, i32
  }
  func.func @transform_12(%arg0: i32, %arg1: memref<16xi32, #tpu.memory_space<smem>>) -> (i32, i32) {
    %c0_i32 = arith.constant 0 : i32
    %c0_i32_0 = arith.constant 0 : i32
    %c0_i32_1 = arith.constant 0 : i32
    return %c0_i32, %c0_i32_0 : i32, i32
  }
  func.func @transform_13(%arg0: i32, %arg1: memref<16xi32, #tpu.memory_space<smem>>) -> (i32, i32) {
    %c0_i32 = arith.constant 0 : i32
    %c0_i32_0 = arith.constant 0 : i32
    %c0_i32_1 = arith.constant 0 : i32
    return %c0_i32, %c0_i32_0 : i32, i32
  }
  func.func @transform_14(%arg0: i32, %arg1: memref<16xi32, #tpu.memory_space<smem>>) -> (i32, i32) {
    %c0_i32 = arith.constant 0 : i32
    %c0_i32_0 = arith.constant 0 : i32
    %c0_i32_1 = arith.constant 0 : i32
    return %c0_i32, %c0_i32_0 : i32, i32
  }
  func.func @transform_15(%arg0: i32, %arg1: memref<16xi32, #tpu.memory_space<smem>>) -> (i32, i32) {
    %c0_i32 = arith.constant 0 : i32
    %c0_i32_0 = arith.constant 0 : i32
    %c0_i32_1 = arith.constant 0 : i32
    return %c0_i32, %c0_i32_0 : i32, i32
  }
  func.func @transform_16(%arg0: i32, %arg1: memref<16xi32, #tpu.memory_space<smem>>) -> (i32, i32) {
    %c0_i32 = arith.constant 0 : i32
    %c0_i32_0 = arith.constant 0 : i32
    %c0_i32_1 = arith.constant 0 : i32
    return %c0_i32, %c0_i32_0 : i32, i32
  }
  func.func @transform_17(%arg0: i32, %arg1: memref<16xi32, #tpu.memory_space<smem>>) -> (i32, i32) {
    %c0_i32 = arith.constant 0 : i32
    %c0_i32_0 = arith.constant 0 : i32
    %c0_i32_1 = arith.constant 0 : i32
    return %c0_i32, %c0_i32_0 : i32, i32
  }
}

</mosaic_0001>

<bundles_post_ra>
// kernel: mae_loss_forward.1
= control target key start
LH: loop header
LB: loop body
LE: loop exit
PB: predicated region body
PF: predicated region fallthrough
CT: control target
= control target key end

     0   :  { %s1734_s0 = inlined_call_operand.vmem [shape: s32[16], index: 0, kind: input, shape index: {}]   ;;  %s1735_s1 = inlined_call_operand.vmem [shape: bf16[16,128], index: 1, kind: input, shape index: {}]   ;;  %s1736_s2 = inlined_call_operand.vmem [shape: f32[16,128], index: 2, kind: input, shape index: {}]   ;;  %s1737_s3 = inlined_call_operand.vmem [shape: f32[16,128], index: 3, kind: input, shape index: {}]   ;;  %s1738_s4 = inlined_call_operand.vmem [shape: f32[16,128], index: 4, kind: input, shape index: {}]   ;;  %s1739_s5 = inlined_call_operand.vmem [shape: bf16[128,128], index: 5, kind: input, shape index: {}]   ;;  %s1740_s6 = inlined_call_operand.vmem [shape: f32[1,128], index: 6, kind: input, shape index: {}]   ;;  %s1741_s7 = inlined_call_operand.vmem [shape: bf16[128,128], index: 7, kind: input, shape index: {}]   ;;  %s1742_s8 = inlined_call_operand.vmem [shape: f32[1,128], index: 8, kind: input, shape index: {}]   ;;  %s1743_s9 = inlined_call_operand.vmem [shape: bf16[128,128], index: 9, kind: input, shape index: {}]   ;;  %s1744_s10 = inlined_call_operand.vmem [shape: f32[1,128], index: 10, kind: input, shape index: {}]   ;;  %s1745_s11 = inlined_call_operand.vmem [shape: bf16[128,128], index: 11, kind: input, shape index: {}]   ;;  %s1746_s12 = inlined_call_operand.vmem [shape: f32[1,128], index: 12, kind: input, shape index: {}]   ;;  %s1747_s13 = inlined_call_operand.vmem [shape: bf16[128,128], index: 13, kind: input, shape index: {}]   ;;  %s1748_s14 = inlined_call_operand.vmem [shape: f32[1,128], index: 14, kind: input, shape index: {}]   ;;  %s1749_s15 = inlined_call_operand.vmem [shape: bf16[128,128], index: 15, kind: input, shape index: {}]   ;;  %s1750_s16 = inlined_call_operand.vmem [shape: f32[1,128], index: 16, kind: input, shape index: {}]   ;;  %s1751_s17 = inlined_call_operand.hbm [shape: f32[1,1], index: 17, kind: output, shape index: {0}]   ;;  %s1752_s18 = inlined_call_operand.vmem [shape: f32[16,128], index: 18, kind: output, shape index: {1}]  }
   0x1   :  { %1755 = sst [smem:[#allocation10_spill]] %s1734_s0 }
   0x2   :  { %1756 = sst [smem:[#allocation11_spill]] %s1735_s1 }
   0x3   :  { %1757 = sst [smem:[#allocation12_spill]] %s1736_s2 }
   0x4   :  { %1758 = sst [smem:[#allocation13_spill]] %s1738_s4 }
   0x5   :  { %s1759_s29 = sld [smem:[#allocation10_spill]] }
   0xb   :  { %s24_s4 = sshll.u32 %s1759_s29, 4  ;;  %s25_s4 = int_to_ptr.vmem [resolvable:$true] %s24_s4 }
   0xc   :  { %s1282_s30 = scalar_lea.vmem %s25_s4, 16  ;;  %p1287_p1 = scmp.lt.s32.totalorder %s25_s4, %s25_s4 }
   0xd   :  { %p1283_p0 = scmp.ne.s32.totalorder %s25_s4, %s1282_s30  ;;  %p1288_p2 = scmp.lt.s32.totalorder %s1282_s30, %s1282_s30 }
   0xf   :  { %p1289_p3 = por %p1288_p2, %p1287_p1 }
  0x11   :  { %p1290_p4 = pnand %p1289_p3, %p1283_p0 }
  0x13   :  { %1293 = shalt.err (!%p1290_p4)  }
  0x14   :  { %s1306_s0 = smov [#allocation5]  }
  0x15   :  { %27 = dma.vmem_to_smem %s25_s4, 16, %s1306_s0, [#allocation4] }
  0x16   :  { %1302 = dma.done.wait [#allocation4], 16 }
  0x17   :  { %1303 = vsyncadd [#allocation4], 4294967280 }
  0x18   :  { %29 = sfence }
  0x19   :  { %v1221_v0 = vld [vmem:[%s1739_s5 + $0x38] sm:$0xff]   ;;  %v1307_v1 = vmov 0.0   ;;  %v1222_v2 = vld [vmem:[%s1739_s5 + $0x30] sm:$0xff]   ;;  %vm1308_vm0 = vmmov 0   ;;  %v1223_v3 = vld [vmem:[%s1739_s5 + $0x28] sm:$0xff]   ;;  %s1760_s28 = sld [smem:[#allocation11_spill]] }
  0x1a   :  { %1095 = vmatprep.subr.bf16.mxu0 %v1307_v1  ;;  %1115 = vmatprep.subr.bf16.mxu1 %v1307_v1  ;;  %v1230_v4 = vld [vmem:[%s1741_s7 + $0x38] sm:$0xff]   ;;  %v1224_v5 = vld [vmem:[%s1739_s5 + $0x20] sm:$0xff]   ;;  %v1231_v6 = vld [vmem:[%s1741_s7 + $0x30] sm:$0xff]  }
  0x1b   :  { %1096 = vmatpush3.bf16.msra.mxu0 %v1221_v0  ;;  %1111 = vmatprep.mubr.msk.bf16.mxu0 %vm1308_vm0, %v1307_v1  ;;  %v1225_v7 = vld [vmem:[%s1739_s5 + $0x18] sm:$0xff]   ;;  %v1232_v8 = vld [vmem:[%s1741_s7 + $0x28] sm:$0xff]   ;;  %v1226_v9 = vld [vmem:[%s1739_s5 + $0x10] sm:$0xff]  }
  0x1c   :  { %1097 = vmatprep.subr.bf16.mxu0 %v1307_v1  ;;  %1131 = vmatprep.mubr.msk.bf16.mxu1 %vm1308_vm0, %v1307_v1  ;;  %v1233_v10 = vld [vmem:[%s1741_s7 + $0x20] sm:$0xff]   ;;  %v1227_v11 = vld [vmem:[%s1739_s5 + $0x8] sm:$0xff]   ;;  %v1234_v12 = vld [vmem:[%s1741_s7 + $0x18] sm:$0xff]  }
  0x1d   :  { %1116 = vmatpush3.bf16.msra.mxu1 %v1230_v4  ;;  %v1228_v13 = vld [vmem:[%s1739_s5] sm:$0xff]  }
  0x1e   :  { %1117 = vmatprep.subr.bf16.mxu1 %v1307_v1 }
  0x1f   :  { %1098 = vmatpush3.bf16.msra.mxu0 %v1222_v2  ;;  %v1229_v14 = vld [vmem:[%s1760_s28] sm:$0xff]  }
  0x20   :  { %1099 = vmatprep.subr.bf16.mxu0 %v1307_v1 }
  0x21   :  { %1118 = vmatpush3.bf16.msra.mxu1 %v1231_v6 }
  0x22   :  { %1119 = vmatprep.subr.bf16.mxu1 %v1307_v1 }
  0x23   :  { %1100 = vmatpush3.bf16.msra.mxu0 %v1223_v3 }
  0x24   :  { %1101 = vmatprep.subr.bf16.mxu0 %v1307_v1 }
  0x25   :  { %1120 = vmatpush3.bf16.msra.mxu1 %v1232_v8 }
  0x26   :  { %1121 = vmatprep.subr.bf16.mxu1 %v1307_v1 }
  0x27   :  { %1102 = vmatpush3.bf16.msra.mxu0 %v1224_v5 }
  0x28   :  { %1103 = vmatprep.subr.bf16.mxu0 %v1307_v1 }
  0x29   :  { %1122 = vmatpush3.bf16.msra.mxu1 %v1233_v10 }
  0x2a   :  { %1123 = vmatprep.subr.bf16.mxu1 %v1307_v1 }
  0x2b   :  { %1104 = vmatpush3.bf16.msra.mxu0 %v1225_v7 }
  0x2c   :  { %1105 = vmatprep.subr.bf16.mxu0 %v1307_v1 }
  0x2d   :  { %1124 = vmatpush3.bf16.msra.mxu1 %v1234_v12 }
  0x2e   :  { %1125 = vmatprep.subr.bf16.mxu1 %v1307_v1 }
  0x2f   :  { %1106 = vmatpush3.bf16.msra.mxu0 %v1226_v9 }
  0x30   :  { %1107 = vmatprep.subr.bf16.mxu0 %v1307_v1 }
  0x33   :  { %1108 = vmatpush3.bf16.msra.mxu0 %v1227_v11 }
  0x34   :  { %1109 = vmatprep.subr.bf16.mxu0 %v1307_v1 }
  0x37   :  { %1110 = vmatpush3.bf16.msra.mxu0 %v1228_v13 }
  0x38   :  { %1135 = vmatprep.subr.bf16.mxu0 %v1307_v1 }
  0x3a   :  { %1112 = vmatmul.mubr.bf16.vlgmr.msra.gmra.mxu0 %v1229_v14 }
  0x3b   :  { %1151 = vmatprep.mubr.msk.bf16.mxu0 %vm1308_vm0, %v1307_v1 }
  0x3c   :  { %30 = vsyncpa [#allocation7], 0  ;;  %v1235_v15 = vld [vmem:[%s1741_s7 + $0x10] sm:$0xff]   ;;  %v1236_v16 = vld [vmem:[%s1741_s7 + $0x8] sm:$0xff]   ;;  %s1761_s2 = sld [smem:[#allocation12_spill]] }
  0x3d   :  { %1126 = vmatpush3.bf16.msra.mxu1 %v1235_v15  ;;  %v1237_v17 = vld [vmem:[%s1741_s7] sm:$0xff]   ;;  %v1238_v30 = vld [vmem:[%s1743_s9 + $0x38] sm:$0xff]   ;;  %v1239_v31 = vld [vmem:[%s1743_s9 + $0x30] sm:$0xff]   ;;  %s1620_s5 = sld [smem:[#allocation5]] }
  0x3e   :  { %1127 = vmatprep.subr.bf16.mxu1 %v1307_v1  ;;  %v968_v18 = vld [vmem:[%s1740_s6] ss:$0 sm:$0xff]  ;;  %1136 = vmatpush3.bf16.msra.mxu0 %v1238_v30  ;;  %v1240_v32 = vld [vmem:[%s1743_s9 + $0x28] sm:$0xff]   ;;  %v1242_v34 = vld [vmem:[%s1743_s9 + $0x18] sm:$0xff]   ;;  %s1624_s29 = sld [smem:[#allocation5 + $0x2]] }
  0x3f   :  { %1137 = vmatprep.subr.bf16.mxu0 %v1307_v1  ;;  %v1241_v33 = vld [vmem:[%s1743_s9 + $0x20] sm:$0xff]   ;;  %v1243_v35 = vld [vmem:[%s1743_s9 + $0x10] sm:$0xff]   ;;  %v1244_v36 = vld [vmem:[%s1743_s9 + $0x8] sm:$0xff]   ;;  %s1628_s30 = sld [smem:[#allocation5 + $0x4]] }
  0x40   :  { %v1245_v37 = vld [vmem:[%s1743_s9] sm:$0xff]   ;;  %v1246_v38 = vld [vmem:[%s1745_s11 + $0x38] sm:$0xff]   ;;  %v1247_v39 = vld [vmem:[%s1745_s11 + $0x30] sm:$0xff]   ;;  %s1635_s1 = sld [smem:[#allocation5 + $0x6]]  ;;  %s1309_s9 = smov [#allocation6]  }
  0x41   :  { %1128 = vmatpush3.bf16.msra.mxu1 %v1236_v16  ;;  %v1248_v40 = vld [vmem:[%s1745_s11 + $0x28] sm:$0xff]   ;;  %v1249_v41 = vld [vmem:[%s1745_s11 + $0x20] sm:$0xff]   ;;  %v1250_v42 = vld [vmem:[%s1745_s11 + $0x18] sm:$0xff]   ;;  %s1637_s20 = sld [smem:[#allocation5 + $0x7]] }
  0x42   :  { %1129 = vmatprep.subr.bf16.mxu1 %v1307_v1  ;;  %v1488_v22 = vld [vmem:[%s1761_s2] sm:$0xff]  ;;  %v1493_v23 = vld [vmem:[%s1761_s2 + $0x8] sm:$0xff]  ;;  %1138 = vmatpush3.bf16.msra.mxu0 %v1239_v31  ;;  %v1251_v5 = vld [vmem:[%s1745_s11 + $0x10] sm:$0xff]   ;;  %s1639_s21 = sld [smem:[#allocation5 + $0x8]] }
  0x43   :  { %1139 = vmatprep.subr.bf16.mxu0 %v1307_v1  ;;  %v978_v43 = vld [vmem:[%s1742_s8] ss:$0 sm:$0xff]  ;;  %v1252_v6 = vld [vmem:[%s1745_s11 + $0x8] sm:$0xff]   ;;  %v1263_v30 = vld [vmem:[%s1749_s15 + $0x30] sm:$0xff]   ;;  %s1626_s8 = sld [smem:[#allocation5 + $0x3]] }
  0x44   :  { %v1253_v7 = vld [vmem:[%s1745_s11] sm:$0xff]   ;;  %v437_v15 = vld [vmem:[%s1737_s3 + $0x8] sm:$0xff]  ;;  %s1641_s4 = sld [smem:[#allocation5 + $0x9]]  ;;  %s859_s6 = scalar_lea.vmem [#allocation3], %s1624_s29 }
  0x45   :  { %1130 = vmatpush3.bf16.msra.mxu1 %v1237_v17  ;;  %v987_v8 = vld [vmem:[%s1744_s10] ss:$0 sm:$0xff]  ;;  %v1264_v31 = vld [vmem:[%s1749_s15 + $0x28] sm:$0xff]   ;;  %s1643_s22 = sld [smem:[#allocation5 + $0xa]]  ;;  %s851_s10 = scalar_lea.vmem [#allocation3], %s1620_s5 }
  0x46   :  { %1140 = vmatpush3.bf16.msra.mxu0 %v1240_v32  ;;  %1155 = vmatprep.subr.bf16.mxu1 %v1246_v38  ;;  %v436_v14 = vld [vmem:[%s1737_s3] sm:$0xff]  ;;  %s1645_s2 = sld [smem:[#allocation5 + $0xb]]  ;;  %s867_s28 = scalar_lea.vmem [#allocation3], %s1628_s30 }
  0x47   :  { %1141 = vmatprep.subr.bf16.mxu0 %v1307_v1  ;;  %v1265_v32 = vld [vmem:[%s1749_s15 + $0x20] sm:$0xff]   ;;  %s1651_s23 = sld [smem:[#allocation5 + $0xe]]  ;;  %s879_s30 = scalar_lea.vmem [#allocation3], %s1637_s20 }
  0x48   :  { %s1653_s24 = sld [smem:[#allocation5 + $0xf]] }
  0x49   :  { %s863_s27 = scalar_lea.vmem [#allocation3], %s1626_s8  ;;  %s875_s8 = scalar_lea.vmem [#allocation3], %s1635_s1 }
  0x4a   :  { %1142 = vmatpush3.bf16.msra.mxu0 %v1241_v33  ;;  %v1266_v33 = vld [vmem:[%s1749_s15 + $0x18] sm:$0xff]   ;;  %s887_s1 = scalar_lea.vmem [#allocation3], %s1641_s4 }
  0x4b   :  { %1143 = vmatprep.subr.bf16.mxu0 %v1307_v1  ;;  %s891_s20 = scalar_lea.vmem [#allocation3], %s1643_s22 }
  0x4d   :  { %s907_s22 = scalar_lea.vmem [#allocation3], %s1651_s23 }
  0x4e   :  { %1144 = vmatpush3.bf16.msra.mxu0 %v1242_v34  ;;  %v996_v34 = vld [vmem:[%s1746_s12] ss:$0 sm:$0xff]  ;;  %s1762_s12 = sld [smem:[#allocation13_spill]] }
  0x4f   :  { %1145 = vmatprep.subr.bf16.mxu0 %v1307_v1 }
  0x52   :  { %1146 = vmatpush3.bf16.msra.mxu0 %v1243_v35 }
  0x53   :  { %1147 = vmatprep.subr.bf16.mxu0 %v1307_v1 }
  0x56   :  { %1148 = vmatpush3.bf16.msra.mxu0 %v1244_v36 }
  0x57   :  { %1149 = vmatprep.subr.bf16.mxu0 %v1307_v1 }
  0x5a   :  { %1150 = vmatpush3.bf16.msra.mxu0 %v1245_v37 }
  0xfa   :  { %v179_v19 = vpop.f32.mrf.mxu0 }
  0xfb   :  { %v180_v21 = vadd.f32 %v968_v18, %v179_v19  ;;  %v445_v19 = vpack.c.bf16 %v437_v15, %v436_v14 }
  0xfc   :  { %v1113_v20 = vpop.f32.mrf.mxu0 }
  0xfd   :  { %v186_v27 = vadd.f32 %v180_v21, %v1488_v22  ;;  %v1254_v21 = vld [vmem:[%s1747_s13 + $0x38] sm:$0xff]  }
  0xfe   :  { %v182_v24 = vpop.f32.mrf.mxu0  ;;  %1175 = vmatprep.subr.bf16.mxu0 %v1254_v21 }
  0xff   :  { %v183_v25 = vadd.f32 %v968_v18, %v182_v24  ;;  %v1255_v24 = vld [vmem:[%s1747_s13 + $0x30] sm:$0xff]  }
 0x100   :  { %v1114_v26 = vpop.f32.mrf.mxu0 }
 0x101   :  { %v187_v28 = vadd.f32 %v183_v25, %v1493_v23  ;;  %v1258_v25 = vld [vmem:[%s1747_s13 + $0x18] sm:$0xff]   ;;  %v1259_v26 = vld [vmem:[%s1747_s13 + $0x10] sm:$0xff]  }
 0x103   :  { %v188_v29 = vpack.c.bf16 %v187_v28, %v186_v27  ;;  %v1260_v27 = vld [vmem:[%s1747_s13 + $0x8] sm:$0xff]   ;;  %v1261_v28 = vld [vmem:[%s1747_s13] sm:$0xff]  }
 0x105   :  { %1132 = vmatmul.mubr.bf16.vlgmr.msra.gmra.mxu1 %v188_v29  ;;  %v1262_v29 = vld [vmem:[%s1749_s15 + $0x38] sm:$0xff]  }
 0x106   :  { %1156 = vmatpush3.bf16.msra.mxu1 %v1246_v38 }
 0x107   :  { %1157 = vmatprep.subr.bf16.mxu1 %v1247_v39 }
 0x10a   :  { %1158 = vmatpush3.bf16.msra.mxu1 %v1247_v39 }
 0x10b   :  { %1159 = vmatprep.subr.bf16.mxu1 %v1248_v40 }
 0x10e   :  { %1160 = vmatpush3.bf16.msra.mxu1 %v1248_v40 }
 0x10f   :  { %1161 = vmatprep.subr.bf16.mxu1 %v1249_v41 }
 0x112   :  { %1162 = vmatpush3.bf16.msra.mxu1 %v1249_v41 }
 0x113   :  { %1163 = vmatprep.subr.bf16.mxu1 %v1250_v42 }
 0x116   :  { %1164 = vmatpush3.bf16.msra.mxu1 %v1250_v42 }
 0x117   :  { %1165 = vmatprep.subr.bf16.mxu1 %v1251_v5 }
 0x11a   :  { %1166 = vmatpush3.bf16.msra.mxu1 %v1251_v5 }
 0x11b   :  { %1167 = vmatprep.subr.bf16.mxu1 %v1252_v6 }
 0x11e   :  { %1168 = vmatpush3.bf16.msra.mxu1 %v1252_v6 }
 0x11f   :  { %1169 = vmatprep.subr.bf16.mxu1 %v1253_v7 }
 0x122   :  { %1170 = vmatpush3.bf16.msra.mxu1 %v1253_v7 }
 0x123   :  { %1195 = vmatprep.subr.bf16.mxu1 %v1262_v29 }
 0x1c5   :  { %v294_v44 = vpop.f32.mrf.mxu1 }
 0x1c6   :  { %v295_v45 = vadd.f32 %v978_v43, %v294_v44 }
 0x1c7   :  { %v1133_v46 = vpop.f32.mrf.mxu1 }
 0x1c8   :  { %v301_v47 = vmul.f32 %v295_v45, %v295_v45 }
 0x1c9   :  { %v297_v48 = vpop.f32.mrf.mxu1 }
 0x1ca   :  { %v303_v49 = vmul.f32 %v301_v47, %v295_v45  ;;  %v298_v50 = vadd.f32 %v978_v43, %v297_v48 }
 0x1cb   :  { %v1134_v51 = vpop.f32.mrf.mxu1 }
 0x1cc   :  { %v305_v52 = vmul.f32 0.044715, %v303_v49  ;;  %v302_v53 = vmul.f32 %v298_v50, %v298_v50 }
 0x1ce   :  { %v307_v54 = vadd.f32 %v305_v52, %v295_v45  ;;  %v304_v55 = vmul.f32 %v302_v53, %v298_v50 }
 0x1d0   :  { %v309_v56 = vmul.f32 0.7978846, %v307_v54  ;;  %v306_v57 = vmul.f32 0.044715, %v304_v55 }
 0x1d2   :  { %1270 = vtanh.f32 %v309_v56  ;;  %v308_v58 = vadd.f32 %v306_v57, %v298_v50 }
 0x1d4   :  { %v310_v59 = vmul.f32 0.7978846, %v308_v58 }
 0x1d6   :  { %1272 = vtanh.f32 %v310_v59 }
 0x1df   :  { %v1271_v60 = vpop.eup %1270 }
 0x1e0   :  { %v313_v61 = vadd.f32 1.0, %v1271_v60 }
 0x1e2   :  { %v315_v63 = vmul.f32 0.5, %v313_v61 }
 0x1e3   :  { %v1273_v62 = vpop.eup %1272 }
 0x1e4   :  { %v314_v0 = vadd.f32 1.0, %v1273_v62  ;;  %v317_v2 = vmul.f32 %v315_v63, %v295_v45 }
 0x1e6   :  { %v316_v1 = vmul.f32 0.5, %v314_v0 }
 0x1e8   :  { %v318_v3 = vmul.f32 %v316_v1, %v298_v50 }
 0x1ea   :  { %v319_v4 = vpack.c.bf16 %v318_v3, %v317_v2 }
 0x1ec   :  { %1152 = vmatmul.mubr.bf16.vlgmr.msra.gmra.mxu0 %v319_v4 }
 0x1ed   :  { %1176 = vmatpush3.bf16.msra.mxu0 %v1254_v21 }
 0x1ee   :  { %1177 = vmatprep.subr.bf16.mxu0 %v1255_v24 }
 0x1f1   :  { %1178 = vmatpush3.bf16.msra.mxu0 %v1255_v24 }
 0x2ac   :  { %v425_v9 = vpop.f32.mrf.mxu0 }
 0x2ad   :  { %v426_v11 = vadd.f32 %v987_v8, %v425_v9 }
 0x2ae   :  { %v1153_v10 = vpop.f32.mrf.mxu0 }
 0x2af   :  { %v432_v17 = vadd.f32 %v426_v11, %v1488_v22  ;;  %v1256_v22 = vld [vmem:[%s1747_s13 + $0x28] sm:$0xff]  }
 0x2b0   :  { %v428_v12 = vpop.f32.mrf.mxu0  ;;  %1179 = vmatprep.subr.bf16.mxu0 %v1256_v22 }
 0x2b1   :  { %v429_v13 = vadd.f32 %v987_v8, %v428_v12  ;;  %1180 = vmatpush3.bf16.msra.mxu0 %v1256_v22  ;;  %v1005_v22 = vld [vmem:[%s1748_s14] ss:$0 sm:$0xff]  ;;  %s1630_s14 = sld [smem:[#allocation5 + $0x5]] }
 0x2b2   :  { %v1154_v16 = vpop.f32.mrf.mxu0 }
 0x2b3   :  { %v433_v18 = vadd.f32 %v429_v13, %v1493_v23  ;;  %v1257_v23 = vld [vmem:[%s1747_s13 + $0x20] sm:$0xff]   ;;  %s1649_s13 = sld [smem:[#allocation5 + $0xd]] }
 0x2b4   :  { %1181 = vmatprep.subr.bf16.mxu0 %v1257_v23 }
 0x2b5   :  { %v444_v20 = vpack.c.bf16 %v433_v18, %v432_v17  ;;  %1182 = vmatpush3.bf16.msra.mxu0 %v1257_v23  ;;  %v1267_v17 = vld [vmem:[%s1749_s15 + $0x10] sm:$0xff]   ;;  %v1268_v18 = vld [vmem:[%s1749_s15 + $0x8] sm:$0xff]  }
 0x2b6   :  { %1183 = vmatprep.subr.bf16.mxu0 %v1258_v25 }
 0x2b7   :  { %1171 = vmatprep.mubr.bf16.mxu1 %v444_v20  ;;  %s871_s5 = scalar_lea.vmem [#allocation3], %s1630_s14  ;;  %s883_s14 = scalar_lea.vmem [#allocation3], %s1639_s21 }
 0x2b8   :  { %1172 = vmatmul.mubr.bf16.vlgmr.msra.gmra.mxu1 %v445_v19  ;;  %v1269_v19 = vld [vmem:[%s1749_s15] sm:$0xff]   ;;  %s1622_s15 = sld [smem:[#allocation5 + $0x1]]  ;;  %s895_s21 = scalar_lea.vmem [#allocation3], %s1645_s2 }
 0x2b9   :  { %1184 = vmatpush3.bf16.msra.mxu0 %v1258_v25  ;;  %1196 = vmatpush3.bf16.msra.mxu1 %v1262_v29  ;;  %s903_s4 = scalar_lea.vmem [#allocation3], %s1649_s13 }
 0x2ba   :  { %1185 = vmatprep.subr.bf16.mxu0 %v1259_v26  ;;  %1197 = vmatprep.subr.bf16.mxu1 %v1263_v30 }
 0x2bd   :  { %1186 = vmatpush3.bf16.msra.mxu0 %v1259_v26  ;;  %1198 = vmatpush3.bf16.msra.mxu1 %v1263_v30 }
 0x2be   :  { %1187 = vmatprep.subr.bf16.mxu0 %v1260_v27  ;;  %1199 = vmatprep.subr.bf16.mxu1 %v1264_v31  ;;  %s855_s11 = scalar_lea.vmem [#allocation3], %s1622_s15 }
 0x2c1   :  { %1188 = vmatpush3.bf16.msra.mxu0 %v1260_v27  ;;  %1200 = vmatpush3.bf16.msra.mxu1 %v1264_v31  ;;  %v1014_v31 = vld [vmem:[%s1750_s16] ss:$0 sm:$0xff]  ;;  %s1647_s16 = sld [smem:[#allocation5 + $0xc]] }
 0x2c2   :  { %1189 = vmatprep.subr.bf16.mxu0 %v1261_v28  ;;  %1201 = vmatprep.subr.bf16.mxu1 %v1265_v32 }
 0x2c5   :  { %1190 = vmatpush3.bf16.msra.mxu0 %v1261_v28  ;;  %1202 = vmatpush3.bf16.msra.mxu1 %v1265_v32 }
 0x2c6   :  { %1203 = vmatprep.subr.bf16.mxu1 %v1266_v33 }
 0x2c7   :  { %s899_s0 = scalar_lea.vmem [#allocation3], %s1647_s16 }
 0x2c9   :  { %1204 = vmatpush3.bf16.msra.mxu1 %v1266_v33 }
 0x2ca   :  { %1205 = vmatprep.subr.bf16.mxu1 %v1267_v17 }
 0x2cd   :  { %1206 = vmatpush3.bf16.msra.mxu1 %v1267_v17 }
 0x2ce   :  { %1207 = vmatprep.subr.bf16.mxu1 %v1268_v18 }
 0x2d1   :  { %1208 = vmatpush3.bf16.msra.mxu1 %v1268_v18 }
 0x2d2   :  { %1209 = vmatprep.subr.bf16.mxu1 %v1269_v19 }
 0x2d5   :  { %1210 = vmatpush3.bf16.msra.mxu1 %v1269_v19 }
 0x378   :  { %v1173_v35 = vpop.f32.mrf.mxu1 }
 0x379   :  { %v560_v36 = vadd.f32 %v1173_v35, %v996_v34 }
 0x37a   :  { %v551_v37 = vpop.f32.mrf.mxu1 }
 0x37b   :  { %v568_v38 = vmul.f32 %v560_v36, %v560_v36  ;;  %v552_v39 = vadd.f32 %v996_v34, %v551_v37 }
 0x37c   :  { %v1174_v40 = vpop.f32.mrf.mxu1 }
 0x37d   :  { %v572_v41 = vmul.f32 %v568_v38, %v560_v36  ;;  %v566_v42 = vmul.f32 %v552_v39, %v552_v39  ;;  %v563_v43 = vadd.f32 %v1174_v40, %v996_v34 }
 0x37e   :  { %v554_v44 = vpop.f32.mrf.mxu1 }
 0x37f   :  { %v576_v45 = vmul.f32 0.044715, %v572_v41  ;;  %v570_v46 = vmul.f32 %v566_v42, %v552_v39  ;;  %v569_v47 = vmul.f32 %v563_v43, %v563_v43  ;;  %v555_v48 = vadd.f32 %v996_v34, %v554_v44 }
 0x381   :  { %v580_v49 = vadd.f32 %v576_v45, %v560_v36  ;;  %v574_v50 = vmul.f32 0.044715, %v570_v46  ;;  %v573_v51 = vmul.f32 %v569_v47, %v563_v43  ;;  %v567_v52 = vmul.f32 %v555_v48, %v555_v48 }
 0x383   :  { %v584_v53 = vmul.f32 0.7978846, %v580_v49  ;;  %v578_v54 = vadd.f32 %v574_v50, %v552_v39  ;;  %v577_v55 = vmul.f32 0.044715, %v573_v51  ;;  %v571_v56 = vmul.f32 %v567_v52, %v555_v48 }
 0x385   :  { %v582_v57 = vmul.f32 0.7978846, %v578_v54  ;;  %v581_v58 = vadd.f32 %v577_v55, %v563_v43  ;;  %v575_v59 = vmul.f32 0.044715, %v571_v56  ;;  %1274 = vtanh.f32 %v584_v53  ;;  %v914_v56 = vld [vmem:[%s1762_s12] sm:$0xff] }
 0x387   :  { %1276 = vtanh.f32 %v582_v57  ;;  %v585_v60 = vmul.f32 0.7978846, %v581_v58  ;;  %v579_v61 = vadd.f32 %v575_v59, %v555_v48  ;;  %v915_v58 = vld [vmem:[%s1762_s12 + $0x8] sm:$0xff] }
 0x389   :  { %1278 = vtanh.f32 %v585_v60  ;;  %v583_v62 = vmul.f32 0.7978846, %v579_v61 }
 0x38b   :  { %1280 = vtanh.f32 %v583_v62 }
 0x392   :  { %v1275_v63 = vpop.eup %1274 }
 0x393   :  { %v592_v3 = vadd.f32 1.0, %v1275_v63 }
 0x394   :  { %v1277_v0 = vpop.eup %1276 }
 0x395   :  { %v590_v1 = vadd.f32 1.0, %v1277_v0  ;;  %v596_v9 = vmul.f32 0.5, %v592_v3 }
 0x396   :  { %v1279_v2 = vpop.eup %1278 }
 0x397   :  { %v593_v4 = vadd.f32 1.0, %v1279_v2  ;;  %v594_v8 = vmul.f32 0.5, %v590_v1  ;;  %v600_v14 = vmul.f32 %v596_v9, %v560_v36 }
 0x398   :  { %v1281_v5 = vpop.eup %1280 }
 0x399   :  { %v597_v6 = vmul.f32 0.5, %v593_v4  ;;  %v591_v7 = vadd.f32 1.0, %v1281_v5  ;;  %v598_v12 = vmul.f32 %v594_v8, %v552_v39 }
 0x39b   :  { %v595_v10 = vmul.f32 0.5, %v591_v7  ;;  %v601_v11 = vmul.f32 %v597_v6, %v563_v43 }
 0x39d   :  { %v599_v13 = vmul.f32 %v595_v10, %v555_v48  ;;  %v603_v16 = vpack.c.bf16 %v601_v11, %v600_v14 }
 0x39f   :  { %v602_v15 = vpack.c.bf16 %v599_v13, %v598_v12 }
 0x3a1   :  { %1191 = vmatprep.mubr.bf16.mxu0 %v602_v15 }
 0x3a2   :  { %1192 = vmatmul.mubr.bf16.vlgmr.msra.gmra.mxu0 %v603_v16 }
 0x462   :  { %v1193_v20 = vpop.f32.mrf.mxu0 }
 0x463   :  { %v718_v28 = vadd.f32 %v1193_v20, %v1005_v22 }
 0x464   :  { %v709_v21 = vpop.f32.mrf.mxu0 }
 0x465   :  { %v710_v26 = vadd.f32 %v1005_v22, %v709_v21 }
 0x466   :  { %v1194_v24 = vpop.f32.mrf.mxu0 }
 0x467   :  { %v721_v23 = vadd.f32 %v1194_v24, %v1005_v22 }
 0x468   :  { %v712_v25 = vpop.f32.mrf.mxu0 }
 0x469   :  { %v713_v27 = vadd.f32 %v1005_v22, %v712_v25  ;;  %v725_v30 = vpack.c.bf16 %v721_v23, %v718_v28 }
 0x46b   :  { %v724_v29 = vpack.c.bf16 %v713_v27, %v710_v26 }
 0x46d   :  { %1211 = vmatprep.mubr.bf16.mxu1 %v724_v29 }
 0x46e   :  { %1212 = vmatmul.mubr.bf16.vlgmr.msra.gmra.mxu1 %v725_v30 }
 0x52e   :  { %v1213_v32 = vpop.f32.mrf.mxu1 }
 0x52f   :  { %v840_v33 = vadd.f32 %v1213_v32, %v1014_v31 }
 0x530   :  { %v831_v34 = vpop.f32.mrf.mxu1 }
 0x531   :  { %848 = vst [vmem:[#allocation3 + $0x10] sm:$0xff] %v840_v33  ;;  %v832_v35 = vadd.f32 %v1014_v31, %v831_v34 }
 0x532   :  { %v1214_v36 = vpop.f32.mrf.mxu1 }
 0x533   :  { %846 = vst [vmem:[#allocation3] sm:$0xff] %v832_v35  ;;  %v843_v37 = vadd.f32 %v1214_v36, %v1014_v31 }
 0x534   :  { %v834_v38 = vpop.f32.mrf.mxu1 }
 0x535   :  { %849 = vst [vmem:[#allocation3 + $0x18] sm:$0xff] %v843_v37  ;;  %v835_v39 = vadd.f32 %v1014_v31, %v834_v38 }
 0x537   :  { %847 = vst [vmem:[#allocation3 + $0x8] sm:$0xff] %v835_v39 }
 0x53e   :  { %v852_v40 = vld [vmem:[%s851_s10] sm:$0x1] }
 0x53f   :  { %v856_v41 = vld [vmem:[%s855_s11] sm:$0x1]  ;;  %853 = vst [vmem:[%s1752_s18] sm:$0x1] %v852_v40 }
 0x540   :  { %v860_v42 = vld [vmem:[%s859_s6] sm:$0x1]  ;;  %857 = vst [vmem:[%s1752_s18 + $0x1] sm:$0x1] %v856_v41 }
 0x541   :  { %861 = vst [vmem:[%s1752_s18 + $0x2] sm:$0x1] %v860_v42  ;;  %v864_v43 = vld [vmem:[%s863_s27] sm:$0x1] }
 0x542   :  { %v868_v44 = vld [vmem:[%s867_s28] sm:$0x1]  ;;  %865 = vst [vmem:[%s1752_s18 + $0x3] sm:$0x1] %v864_v43 }
 0x543   :  { %v872_v45 = vld [vmem:[%s871_s5] sm:$0x1]  ;;  %869 = vst [vmem:[%s1752_s18 + $0x4] sm:$0x1] %v868_v44 }
 0x544   :  { %873 = vst [vmem:[%s1752_s18 + $0x5] sm:$0x1] %v872_v45  ;;  %v876_v46 = vld [vmem:[%s875_s8] sm:$0x1] }
 0x545   :  { %v880_v47 = vld [vmem:[%s879_s30] sm:$0x1]  ;;  %877 = vst [vmem:[%s1752_s18 + $0x6] sm:$0x1] %v876_v46 }
 0x546   :  { %v884_v48 = vld [vmem:[%s883_s14] sm:$0x1]  ;;  %881 = vst [vmem:[%s1752_s18 + $0x7] sm:$0x1] %v880_v47  ;;  %s911_s14 = scalar_lea.vmem [#allocation3], %s1653_s24 }
 0x547   :  { %885 = vst [vmem:[%s1752_s18 + $0x8] sm:$0x1] %v884_v48  ;;  %v888_v49 = vld [vmem:[%s887_s1] sm:$0x1] }
 0x548   :  { %v892_v50 = vld [vmem:[%s891_s20] sm:$0x1]  ;;  %889 = vst [vmem:[%s1752_s18 + $0x9] sm:$0x1] %v888_v49 }
 0x549   :  { %v896_v51 = vld [vmem:[%s895_s21] sm:$0x1]  ;;  %893 = vst [vmem:[%s1752_s18 + $0xa] sm:$0x1] %v892_v50 }
 0x54a   :  { %897 = vst [vmem:[%s1752_s18 + $0xb] sm:$0x1] %v896_v51  ;;  %v900_v52 = vld [vmem:[%s899_s0] sm:$0x1] }
 0x54b   :  { %v904_v53 = vld [vmem:[%s903_s4] sm:$0x1]  ;;  %901 = vst [vmem:[%s1752_s18 + $0xc] sm:$0x1] %v900_v52 }
 0x54c   :  { %v908_v54 = vld [vmem:[%s907_s22] sm:$0x1]  ;;  %905 = vst [vmem:[%s1752_s18 + $0xd] sm:$0x1] %v904_v53 }
 0x54d   :  { %909 = vst [vmem:[%s1752_s18 + $0xe] sm:$0x1] %v908_v54  ;;  %v912_v55 = vld [vmem:[%s911_s14] sm:$0x1] }
 0x54e   :  { %913 = vst [vmem:[%s1752_s18 + $0xf] sm:$0x1] %v912_v55  ;;  %v916_v57 = vld [vmem:[%s1752_s18] sm:$0xff] }
 0x54f   :  { %v918_v59 = vsub.f32 %v914_v56, %v916_v57 }
 0x551   :  { %v920_v62 = vmul.f32 %v918_v59, %v918_v59 }
 0x555   :  { %v917_v60 = vld [vmem:[%s1752_s18 + $0x8] sm:$0xff] }
 0x556   :  { %v919_v61 = vsub.f32 %v915_v58, %v917_v60 }
 0x558   :  { %v921_v63 = vmul.f32 %v919_v61, %v919_v61 }
 0x55a   :  { %v922_v0 = vadd.f32 %v921_v63, %v920_v62 }
 0x55c   :  { %923 = vadd.xlane.f32.xlu0 %v922_v0 }
 0x5e5   :  { %v924_v1 = vpop.xlane.xlu0 %923 }
 0x5e6   :  { %v925_v2 = vrot.slane %v924_v1, 4 }
 0x5e8   :  { %v926_v3 = vadd.f32 %v925_v2, %v924_v1 }
 0x5ea   :  { %v927_v4 = vrot.slane %v926_v3, 2 }
 0x5ec   :  { %v928_v5 = vadd.f32 %v927_v4, %v926_v3 }
 0x5ee   :  { %v929_v6 = vrot.slane %v928_v5, 1 }
 0x5f0   :  { %v930_v7 = vadd.f32 %v929_v6, %v928_v5 }
 0x5f2   :  { %1215 = vpush %v930_v7 }
 0x623   :  { %s1216_s20 = spop %1215 }
 0x624   :  { %s932_s21 = smul.f32 0.0009765625, %s1216_s20 }
 0x626   :  { %934 = sst [smem:[#allocation6]] %s932_s21 }
 0x627   :  { %942 = dma.smem_to_hbm %s1309_s9, 16, %s1751_s17, [#allocation7]  }
 0x628   :  { %1304 = dma.done.wait [#allocation7], 16  }
 0x629   :  { %1305 = vsyncadd [#allocation7], 4294967280 }
 0x62a   :  { %950 = sfence }
 0x62b   :  { %951 = vsyncpa [#allocation7], 1 }

</bundles_post_ra>
